<compile_context>
chip_gen: v7x
topology: tpu7x:2x2x1
jax: 0.10.0
libtpu: 0.0.40
codegen_flags: <defaults>
</compile_context>

<pallas_src>
import math
import jax
import jax.numpy as jnp
from jax.experimental import pallas as pl
from jax.experimental.pallas import tpu as pltpu


def _round_up(v, m):
    return ((v + m - 1) // m) * m


def _downpool_linear_kernel(x_ref, w_ref, b_ref, o_ref):
    # x_ref: (TM, K) native dtype; cast to the MXU dtype in VMEM (VPU has slack,
    # and this avoids a separate wrapper-side cast pass over X in HBM).
    # w_ref: (K, Np) bf16 resident, b_ref: (1, Np) f32, o_ref: (TM, Np).
    x = x_ref[...].astype(w_ref.dtype)
    acc = jnp.dot(x, w_ref[...], preferred_element_type=jnp.float32)
    o_ref[...] = (acc + b_ref[...]).astype(o_ref.dtype)


def prepare_downpool_params(weight, bias, compute_dtype=jnp.bfloat16):
    """One-time param prep (hoisted out of the per-call hot path).

    weight: (out, in) torch layout; bias: (out,).
    Returns (w_kn, b_row, n_out):
      w_kn : (K, Np) weight in compute_dtype, Np = round_up(out, 128)  (lane-dense Y)
      b_row: (1, Np) bias in f32 (zero-padded)
      n_out: true output width (out_features)
    """
    n_out, k = weight.shape
    n_pad = _round_up(max(n_out, 1), 128)
    w_kn = jnp.zeros((k, n_pad), compute_dtype).at[:, :n_out].set(
        weight.T.astype(compute_dtype))
    b_row = jnp.zeros((1, n_pad), jnp.float32).at[:, :n_out].set(
        bias.astype(jnp.float32).reshape(1, n_out))
    return w_kn, b_row, n_out


def _pick_row_tile(M, K, N_pad, x_bytes, o_bytes, w_bytes, tm, vmem_limit_bytes):
    """Pick TM (rows per grid step).

    Per-step VMEM ~ 2*TM*K*x_bytes (X dbuf) + 2*TM*N_pad*o_bytes (Y dbuf)
                  + 2*K*N_pad*w_bytes + 2*N_pad*4 (resident W + bias buffers).
    Constraints: TM multiple of 8 (or TM == M when M < 8);
    >= 2 grid steps when M allows (keeps both v7x TensorCores busy).
    """
    if M <= 8:
        return M  # block spans the full row extent; valid even when M % 8 != 0
    resident = 2 * K * N_pad * w_bytes + 2 * N_pad * 4
    per_row = 2 * (K * x_bytes + N_pad * o_bytes)
    budget = int(0.75 * vmem_limit_bytes)  # headroom for compiler scratch
    avail = budget - resident
    tm_cap = max(8, (avail // per_row) // 8 * 8) if avail > 0 else 8
    tm_eff = max(8, (min(tm, tm_cap) // 8) * 8)
    steps = max(2, pl.cdiv(M, tm_eff))          # >= 2 steps for v7x megacore
    TM = _round_up(pl.cdiv(M, steps), 8)
    return max(8, min(TM, tm_eff, _round_up(M, 8)))


def downpool_forward(x, w_kn, b_row, n_out, pooling_factor, *,
                     out_dtype=None, tm=1024, vmem_limit_bytes=32 * 1024 * 1024):
    """x: (..., T, H). Returns (B, T // p, n_out); B = prod(leading dims)."""
    T, H = x.shape[-2], x.shape[-1]
    p = pooling_factor
    assert T % p == 0, "T must be divisible by pooling_factor"
    K = H * p
    assert w_kn.shape[0] == K
    N_pad = w_kn.shape[1]
    out_dtype = x.dtype if out_dtype is None else jnp.dtype(out_dtype)

    # Pooled reshape (identical to torch's x.reshape(-1, T//p, H*p)); the flatten to
    # (M, K) is a free metadata reshape of a contiguous array -- no HBM pass, no cast.
    x_flat = x.reshape(-1, K)
    M = x_flat.shape[0]
    n_pooled = T // p
    B = M // n_pooled

    x_bytes = x.dtype.itemsize
    o_bytes = jnp.dtype(out_dtype).itemsize
    w_bytes = w_kn.dtype.itemsize

    TM = _pick_row_tile(M, K, N_pad, x_bytes, o_bytes, w_bytes, tm, vmem_limit_bytes)
    grid = (pl.cdiv(M, TM),)  # ragged last block handled by Pallas; no M padding

    cost = pl.CostEstimate(
        flops=2 * M * K * N_pad,
        transcendentals=0,
        bytes_accessed=(M * K * x_bytes + K * N_pad * w_bytes + N_pad * 4
                        + M * N_pad * o_bytes))

    out_flat = pl.pallas_call(
        _downpool_linear_kernel,
        out_shape=jax.ShapeDtypeStruct((M, N_pad), out_dtype),
        grid_spec=pltpu.PrefetchScalarGridSpec(
            num_scalar_prefetch=0,
            grid=grid,
            in_specs=[
                pl.BlockSpec((TM, K), lambda i: (i, 0)),       # streamed X tiles
                pl.BlockSpec((K, N_pad), lambda i: (0, 0)),    # resident weight
                pl.BlockSpec((1, N_pad), lambda i: (0, 0)),    # resident bias
            ],
            out_specs=pl.BlockSpec((TM, N_pad), lambda i: (i, 0)),
        ),
        compiler_params=pltpu.CompilerParams(
            dimension_semantics=("parallel",),    # shard M across TCs on v7x
            vmem_limit_bytes=vmem_limit_bytes),
        cost_estimate=cost,
    )(x_flat, w_kn, b_row)

    # Only slice lanes when the true output width isn't already lane-dense
    # (typical SaShiMi stages have n_out % 128 == 0, so this is usually skipped).
    if N_pad != n_out:
        out_flat = out_flat[:, :n_out]
    return out_flat.reshape(B, n_pooled, n_out)


def init_downpool_params(key, signal_dim, pooling_factor=4, expansion_factor=2,
                         dtype=jnp.float32):
    """Deterministic nn.Linear-style init: U(-1/sqrt(in), 1/sqrt(in)), torch layout."""
    in_features = signal_dim * pooling_factor
    out_features = signal_dim * expansion_factor
    kw, kb = jax.random.split(key)
    bound = 1.0 / math.sqrt(in_features)
    weight = jax.random.uniform(kw, (out_features, in_features), dtype,
                                minval=-bound, maxval=bound)
    bias = jax.random.uniform(kb, (out_features,), dtype,
                              minval=-bound, maxval=bound)
    return weight, bias


# TODO(synk): get_recurrent_runner() raises in the reference module by design; no
# recurrent-mode kernel is implemented here.

if __name__ == "__main__":
    # Small shapes consistent with the module: batch=2, T=16, H=8, p=4, q=2.
    B, T, H = 2, 16, 8
    pooling_factor, expansion_factor = 4, 2

    key = jax.random.PRNGKey(0)
    kx, kp = jax.random.split(key)
    x = jax.random.normal(kx, (B, T, H), jnp.float32)
    weight, bias = init_downpool_params(kp, H, pooling_factor, expansion_factor)

    # One-time prep (pre-transposed, lane-padded, bf16 weight); reused every call.
    w_kn, b_row, n_out = prepare_downpool_params(weight, bias)

    out = downpool_forward(x, w_kn, b_row, n_out, pooling_factor)
    out = jax.block_until_ready(out)
    assert out.shape == (B, T // pooling_factor, H * expansion_factor)

    # Reference checks in plain JAX (same semantics as the torch module).
    x2 = x.reshape(-1, T // pooling_factor, H * pooling_factor)
    ref_f32 = x2 @ weight.T + bias                        # exact module semantics
    x2_bf = x2.astype(jnp.bfloat16).astype(jnp.float32)   # kernel's bf16 operand path
    w_bf = weight.T.astype(jnp.bfloat16).astype(jnp.float32)
    ref_bf16 = x2_bf @ w_bf + bias

    assert jnp.allclose(out, ref_bf16, atol=1e-3, rtol=1e-3)
    assert jnp.allclose(out, ref_f32, atol=5e-2, rtol=5e-2)

    print("KERNEL_OK")
</pallas_src>

<mosaic_0001>
module attributes {stable_mosaic.version = 11 : i64} {
  func.func @_downpool_linear_kernel(%arg0: i32, %arg1: memref<8x32xf32, #tpu.memory_space<vmem>>, %arg2: memref<32x128xbf16, #tpu.memory_space<vmem>>, %arg3: memref<1x128xf32, #tpu.memory_space<vmem>>, %arg4: memref<8x128xf32, #tpu.memory_space<vmem>>) attributes {dimension_semantics = [#tpu.dimension_semantics<parallel>], iteration_bounds = array<i64: 1>, scalar_prefetch = 0 : i64, scratch_operands = 0 : i64, tpu.core_type = #tpu.core_type<tc>, window_params = [{transform_indices = @transform_0, window_bounds = array<i64: 8, 32>}, {pipeline_mode = #tpu.pipeline_mode<synchronous>, transform_indices = @transform_1, window_bounds = array<i64: 32, 128>}, {pipeline_mode = #tpu.pipeline_mode<synchronous>, transform_indices = @transform_2, window_bounds = array<i64: 1, 128>}, {transform_indices = @transform_3, window_bounds = array<i64: 8, 128>}]} {
    %c0 = arith.constant 0 : index
    %c0_0 = arith.constant 0 : index
    %0 = vector.load %arg1[%c0, %c0_0] : memref<8x32xf32, #tpu.memory_space<vmem>>, vector<8x32xf32>
    %1 = arith.truncf %0 : vector<8x32xf32> to vector<8x32xbf16>
    %c0_1 = arith.constant 0 : index
    %c0_2 = arith.constant 0 : index
    %2 = vector.load %arg2[%c0_1, %c0_2] : memref<32x128xbf16, #tpu.memory_space<vmem>>, vector<32x128xbf16>
    %cst = arith.constant dense<0.000000e+00> : vector<8x128xf32>
    %3 = tpu.matmul %1, %2, %cst {dimension_numbers = #tpu.dot_dimension_numbers<[1], [0], [0], [1], [0, 0, 1, 1], [], []>} : vector<8x32xbf16>, vector<32x128xbf16>, vector<8x128xf32> -> vector<8x128xf32>
    %c0_3 = arith.constant 0 : index
    %c0_4 = arith.constant 0 : index
    %4 = vector.load %arg3[%c0_3, %c0_4] : memref<1x128xf32, #tpu.memory_space<vmem>>, vector<1x128xf32>
    %5 = vector.broadcast %4 : vector<1x128xf32> to vector<8x128xf32>
    %6 = arith.addf %3, %5 : vector<8x128xf32>
    %c0_5 = arith.constant 0 : index
    %c0_6 = arith.constant 0 : index
    %7 = vector.load %arg4[%c0_5, %c0_6] : memref<8x128xf32, #tpu.memory_space<vmem>>, vector<8x128xf32>
    tpu.vector_store %arg4[%c0_5, %c0_6], %6 {strides = array<i32>} : memref<8x128xf32, #tpu.memory_space<vmem>>, vector<8x128xf32>,
    return
  }
  func.func @transform_0(%arg0: i32) -> (i32, i32) {
    %c0_i32 = arith.constant 0 : i32
    %c0_i32_0 = arith.constant 0 : i32
    return %arg0, %c0_i32 : i32, i32
  }
  func.func @transform_1(%arg0: i32) -> (i32, i32) {
    %c0_i32 = arith.constant 0 : i32
    %c0_i32_0 = arith.constant 0 : i32
    %c0_i32_1 = arith.constant 0 : i32
    return %c0_i32, %c0_i32_0 : i32, i32
  }
  func.func @transform_2(%arg0: i32) -> (i32, i32) {
    %c0_i32 = arith.constant 0 : i32
    %c0_i32_0 = arith.constant 0 : i32
    %c0_i32_1 = arith.constant 0 : i32
    return %c0_i32, %c0_i32_0 : i32, i32
  }
  func.func @transform_3(%arg0: i32) -> (i32, i32) {
    %c0_i32 = arith.constant 0 : i32
    %c0_i32_0 = arith.constant 0 : i32
    return %arg0, %c0_i32 : i32, i32
  }
}

</mosaic_0001>

<bundles_post_ra>
// kernel: tpu_custom_call.1
= control target key start
LH: loop header
LB: loop body
LE: loop exit
PB: predicated region body
PF: predicated region fallthrough
CT: control target
= control target key end

     0   :  { %8 = vsyncpa [#allocation3], 0  ;;  %s297_s0 = inlined_call_operand.hbm [shape: f32[8,32], index: 0, kind: input, shape index: {}]   ;;  %s298_s1 = inlined_call_operand.hbm [shape: bf16[32,128], index: 1, kind: input, shape index: {}]   ;;  %s299_s2 = inlined_call_operand.vmem [shape: f32[1,128], index: 2, kind: input, shape index: {}]   ;;  %s300_s3 = inlined_call_operand.hbm [shape: f32[8,128], index: 3, kind: output, shape index: {}]  }
   0x1   :  { %9 = vsyncpa [#allocation6], 0 }
   0x2   :  { %10 = vsyncpa [#allocation4], 0  ;;  %s224_s12 = smov [#allocation2]   ;;  %s225_s14 = smov [#allocation5]  }
   0x3   :  { %s17_s13 = sshll.u32 %s224_s12, 4  ;;  %s26_s15 = sshll.u32 %s225_s14, 4  ;;  %s18_s13 = int_to_ptr.vmem [resolvable:$true] %s17_s13  ;;  %s251_s15 = int_to_ptr.vmem [resolvable:$true] %s26_s15 }
   0x4   :  { %s152_s18 = scalar_lea.hbm %s297_s0, 128 }
   0x5   :  { %p153_p0 = scmp.ne.s32.totalorder %s297_s0, %s152_s18  ;;  %p156_p1 = scmp.lt.u32.totalorder %s152_s18, %s297_s0 }
   0x7   :  { %p158_p2 = pnand %p156_p1, %p153_p0 }
   0x9   :  { %161 = shalt.err (!%p158_p2)
}
   0xa   :  { %s162_s23 = scalar_lea.vmem %s18_s13, 128  ;;  %p167_p4 = scmp.lt.s32.totalorder %s18_s13, %s18_s13 }
   0xb   :  { %p163_p3 = scmp.ne.s32.totalorder %s18_s13, %s162_s23  ;;  %p168_p5 = scmp.lt.s32.totalorder %s162_s23, %s162_s23 }
   0xd   :  { %p169_p6 = por %p168_p5, %p167_p4 }
   0xf   :  { %p170_p7 = pnand %p169_p6, %p163_p3 }
  0x11   :  { %173 = shalt.err (!%p170_p7)
}
  0x12   :  { %20 = dma.hbm_to_vmem [thread:$0]  %s297_s0, 128, %s18_s13, [#allocation3]  }
  0x13   :  { %s174_s28 = scalar_lea.hbm %s298_s1, 256 }
  0x14   :  { %p175_p8 = scmp.ne.s32.totalorder %s298_s1, %s174_s28  ;;  %p178_p9 = scmp.lt.u32.totalorder %s174_s28, %s298_s1 }
  0x16   :  { %p180_p10 = pnand %p178_p9, %p175_p8 }
  0x18   :  { %183 = shalt.err (!%p180_p10)
}
  0x19   :  { %s184_s6 = scalar_lea.vmem %s251_s15, 256  ;;  %p189_p12 = scmp.lt.s32.totalorder %s251_s15, %s251_s15 }
  0x1a   :  { %p185_p11 = scmp.ne.s32.totalorder %s251_s15, %s184_s6  ;;  %p190_p13 = scmp.lt.s32.totalorder %s184_s6, %s184_s6 }
  0x1c   :  { %p191_p0 = por %p190_p13, %p189_p12 }
  0x1e   :  { %p192_p1 = pnand %p191_p0, %p185_p11 }
  0x20   :  { %195 = shalt.err (!%p192_p1)
}
  0x21   :  { %s226_s0 = smov 64   ;;  %s227_s7 = smov 4  }
  0x22   :  { %32 = dma.hbm_to_vmem [thread:$0]  %s298_s1, 256, %s251_s15, [#allocation6], %s226_s0, %s226_s0, %s227_s7  }
  0x23   :  { %218 = dma.done.wait [#allocation3], 128  }
  0x24   :  { %219 = vsyncadd [#allocation3], 4294967168 }
  0x25   :  { %220 = dma.done.wait [#allocation6], 256  }
  0x26   :  { %221 = vsyncadd [#allocation6], 4294967040  ;;  %v228_v0 = vmov 0.0   ;;  %vm229_vm0 = vmmov 0   ;;  %v150_v1 = vld [vmem:[#allocation5] sm:$0xff]   ;;  %v151_v2 = vld [vmem:[#allocation5 + $0x8] sm:$0xff]  }
  0x27   :  { %135 = vmatprep.subr.bf16.mxu0 %v228_v0  ;;  %139 = vmatprep.mubr.msk.bf16.mxu0 %vm229_vm0, %v228_v0  ;;  %v42_v3 = vld [vmem:[#allocation2] sm:$0xff]  ;;  %vm67_vm1 = vcmask 261120   ;;  %s230_s1 = smov [#allocation7]  }
  0x28   :  { %136 = vmatpush3.bf16.msra.mxu0 %v150_v1  ;;  %v43_v4 = vpack.c.bf16 %v42_v3, %v42_v3  ;;  %v128_v5 = vld [vmem:[%s299_s2] ss:$0 sm:$0xff]  ;;  %s118_s12 = sshll.u32 %s230_s1, 4  ;;  %s119_s12 = int_to_ptr.vmem [resolvable:$true] %s118_s12 }
  0x29   :  { %137 = vmatprep.subr.bf16.mxu0 %v228_v0  ;;  %s196_s13 = scalar_lea.vmem %s119_s12, 128  ;;  %p201_p3 = scmp.lt.s32.totalorder %s119_s12, %s119_s12 }
  0x2a   :  { %p197_p2 = scmp.ne.s32.totalorder %s119_s12, %s196_s13  ;;  %p202_p4 = scmp.lt.s32.totalorder %s196_s13, %s196_s13 }
  0x2c   :  { %138 = vmatpush3.bf16.msra.mxu0 %v151_v2  ;;  %p203_p5 = por %p202_p4, %p201_p3 }
  0x2e   :  { %p204_p6 = pnand %p203_p5, %p197_p2 }
  0x2f   :  { %140 = vmatmul.mubr.msk.bf16.vlgmr.msra.gmra.mrb[0].mxu0 %vm67_vm1, %v43_v4 }
 0x102   :  { %v105_v6 = vpop.f32.mrb[0].mxu0 }
 0x103   :  { %v106_v7 = vadd.f32 %v128_v5, %v105_v6  ;;  %v141_v8 = vpop.f32.mrb[1].mxu0 }
 0x104   :  { %v108_v9 = vpop.f32.mrb[2].mxu0 }
 0x105   :  { %111 = vst [vmem:[#allocation7] sm:$0xff] %v106_v7  ;;  %v142_v10 = vpop.f32.mrb[3].mxu0 }
 0x106   :  { %207 = shalt.err (!%p204_p6)
}
 0x107   :  { %s208_s2 = scalar_lea.hbm %s300_s3, 128 }
 0x108   :  { %p209_p7 = scmp.ne.s32.totalorder %s300_s3, %s208_s2  ;;  %p212_p8 = scmp.lt.u32.totalorder %s208_s2, %s300_s3 }
 0x10a   :  { %p214_p9 = pnand %p212_p8, %p209_p7 }
 0x10c   :  { %217 = shalt.err (!%p214_p9)
}
 0x10d   :  { %121 = dma.vmem_to_hbm [thread:$0]  %s119_s12, 128, %s300_s3, [#allocation4]  }
 0x10e   :  { %222 = dma.done.wait [#allocation4], 128  }
 0x10f   :  { %223 = vsyncadd [#allocation4], 4294967168 }
 0x110   :  { %125 = vsyncpa [#allocation3], 1 }
 0x111   :  { %126 = vsyncpa [#allocation6], 1 }
 0x112   :  { %127 = vsyncpa [#allocation4], 1 }

</bundles_post_ra>
